<compile_context>
chip_gen: v6e
topology: v6e:2x2x1
jax: 0.10.0
libtpu: 0.0.40
codegen_flags: <defaults>
</compile_context>

<pallas_src>
import jax
import jax.numpy as jnp
from jax.experimental import pallas as pl
from jax.experimental.pallas import tpu as pltpu  # noqa: F401  (kept for TPU-specific tuning hooks)


def _linear_model_kernel(xn_ref, xstep_ref, u_ref, d_ref,
                         wx_ref, wu_ref, wd_ref, b_ref,
                         o1_ref, o2_ref):
    """Fused LinearModel forward:  oi = xi @ wx + (u @ wu + d @ wd + b_total)."""
    # Shared control/disturbance projection + all folded biases (computed once,
    # reused by both outputs).  f32 operands, f32 accumulation.
    shared = (jnp.dot(u_ref[...], wu_ref[...], preferred_element_type=jnp.float32)
              + jnp.dot(d_ref[...], wd_ref[...], preferred_element_type=jnp.float32)
              + b_ref[...])
    wx = wx_ref[...]
    o1_ref[...] = (jnp.dot(xn_ref[...], wx, preferred_element_type=jnp.float32)
                   + shared).astype(o1_ref.dtype)
    o2_ref[...] = (jnp.dot(xstep_ref[...], wx, preferred_element_type=jnp.float32)
                   + shared).astype(o2_ref.dtype)


def fuse_params(p):
    """One-time parameter prep: fold the four bias vectors into a single (1, nx) row."""
    nx = p["wx"].shape[0]
    return dict(
        wx=p["wx"],                                                   # (nx, nx)
        wu=p["wu"],                                                   # (nu, nx)
        wd=p["wd"],                                                   # (nd, nx)
        b_total=(p["bx"] + p["bu"] + p["bd"] + p["bias"]).reshape(1, nx),  # (1, nx), f32
    )


def linear_model_forward(xn, xstep, u, d, fused):
    """Pallas implementation of LinearModel.forward.

    Returns (xnext, xstep_next), each (batch, nx).  Single pallas_call, no wrapper
    concats or slices.
    """
    batch, nx = xn.shape
    nu = u.shape[1]
    nd = d.shape[1]

    # Single grid point, full-array blocks (block dims == full array dims, so the
    # (8,128) divisibility constraint does not apply).  Total footprint is a few KB.
    def full(shape):
        return pl.BlockSpec(shape, lambda: tuple(0 for _ in shape))

    o1, o2 = pl.pallas_call(
        _linear_model_kernel,
        out_shape=(jax.ShapeDtypeStruct((batch, nx), xn.dtype),
                   jax.ShapeDtypeStruct((batch, nx), xn.dtype)),
        grid=(),
        in_specs=[
            full((batch, nx)),   # xn
            full((batch, nx)),   # xstep
            full((batch, nu)),   # u
            full((batch, nd)),   # d
            full((nx, nx)),      # wx
            full((nu, nx)),      # wu
            full((nd, nx)),      # wd
            full((1, nx)),       # b_total
        ],
        out_specs=(full((batch, nx)), full((batch, nx))),
    )(xn, xstep, u, d, fused["wx"], fused["wu"], fused["wd"], fused["b_total"])

    return o1, o2


def init_params(key, nx, nu, nd, dtype=jnp.float32):
    """Deterministic synthetic parameters (shapes match nn.Linear + bias param)."""
    ks = jax.random.split(key, 7)
    # Stored already transposed relative to torch: (in_features, out_features).
    wu = jax.random.normal(ks[0], (nu, nx), dtype) * 0.1
    bu = jax.random.normal(ks[1], (nx,), dtype) * 0.1
    wx = jax.random.normal(ks[2], (nx, nx), dtype) * 0.1
    bx = jax.random.normal(ks[3], (nx,), dtype) * 0.1
    wd = jax.random.normal(ks[4], (nd, nx), dtype) * 0.1
    bd = jax.random.normal(ks[5], (nx,), dtype) * 0.1
    bias = jax.random.normal(ks[6], (nx,), dtype)
    return dict(wu=wu, bu=bu, wx=wx, bx=bx, wd=wd, bd=bd, bias=bias)


def reference_forward(xn, xstep, u, d, p):
    """Pure-JAX f32 reference mirroring the PyTorch forward."""
    ud = u @ p["wu"] + p["bu"] + d @ p["wd"] + p["bd"]
    o1 = xn @ p["wx"] + p["bx"] + ud + p["bias"]
    o2 = xstep @ p["wx"] + p["bx"] + ud + p["bias"]
    return o1, o2


if __name__ == "__main__":
    batch, nx, nu, nd = 8, 32, 16, 8

    key = jax.random.PRNGKey(0)
    kxn, kxs, ku, kd, kp = jax.random.split(key, 5)
    xn = jax.random.normal(kxn, (batch, nx), jnp.float32)
    xstep = jax.random.normal(kxs, (batch, nx), jnp.float32)
    u = jax.random.normal(ku, (batch, nu), jnp.float32)
    d = jax.random.normal(kd, (batch, nd), jnp.float32)
    params = init_params(kp, nx, nu, nd)
    fused = fuse_params(params)

    out1, out2 = linear_model_forward(xn, xstep, u, d, fused)
    jax.block_until_ready((out1, out2))

    # f32 operands inside the kernel -> tolerance only needs to cover MXU pass rounding.
    ref1, ref2 = reference_forward(xn, xstep, u, d, params)
    assert out1.shape == (batch, nx) and out2.shape == (batch, nx)
    assert jnp.allclose(out1, ref1, atol=1e-2, rtol=1e-2), float(jnp.max(jnp.abs(out1 - ref1)))
    assert jnp.allclose(out2, ref2, atol=1e-2, rtol=1e-2), float(jnp.max(jnp.abs(out2 - ref2)))

    print("KERNEL_OK")
</pallas_src>

<mosaic_0001>
module attributes {stable_mosaic.version = 11 : i64} {
  func.func @_linear_model_kernel(%arg0: memref<8x32xf32, #tpu.memory_space<vmem>>, %arg1: memref<8x32xf32, #tpu.memory_space<vmem>>, %arg2: memref<8x16xf32, #tpu.memory_space<vmem>>, %arg3: memref<8x8xf32, #tpu.memory_space<vmem>>, %arg4: memref<32x32xf32, #tpu.memory_space<vmem>>, %arg5: memref<16x32xf32, #tpu.memory_space<vmem>>, %arg6: memref<8x32xf32, #tpu.memory_space<vmem>>, %arg7: memref<1x32xf32, #tpu.memory_space<vmem>>, %arg8: memref<8x32xf32, #tpu.memory_space<vmem>>, %arg9: memref<8x32xf32, #tpu.memory_space<vmem>>) attributes {dimension_semantics = [], scalar_prefetch = 0 : i64, scratch_operands = 0 : i64, tpu.core_type = #tpu.core_type<tc>} {
    %c0 = arith.constant 0 : index
    %c0_0 = arith.constant 0 : index
    %0 = vector.load %arg2[%c0, %c0_0] : memref<8x16xf32, #tpu.memory_space<vmem>>, vector<8x16xf32>
    %c0_1 = arith.constant 0 : index
    %c0_2 = arith.constant 0 : index
    %1 = vector.load %arg5[%c0_1, %c0_2] : memref<16x32xf32, #tpu.memory_space<vmem>>, vector<16x32xf32>
    %cst = arith.constant dense<0.000000e+00> : vector<8x32xf32>
    %2 = tpu.matmul %0, %1, %cst {dimension_numbers = #tpu.dot_dimension_numbers<[1], [0], [0], [1], [0, 0, 1, 1], [], []>} : vector<8x16xf32>, vector<16x32xf32>, vector<8x32xf32> -> vector<8x32xf32>
    %c0_3 = arith.constant 0 : index
    %c0_4 = arith.constant 0 : index
    %3 = vector.load %arg3[%c0_3, %c0_4] : memref<8x8xf32, #tpu.memory_space<vmem>>, vector<8x8xf32>
    %c0_5 = arith.constant 0 : index
    %c0_6 = arith.constant 0 : index
    %4 = vector.load %arg6[%c0_5, %c0_6] : memref<8x32xf32, #tpu.memory_space<vmem>>, vector<8x32xf32>
    %cst_7 = arith.constant dense<0.000000e+00> : vector<8x32xf32>
    %5 = tpu.matmul %3, %4, %cst_7 {dimension_numbers = #tpu.dot_dimension_numbers<[1], [0], [0], [1], [0, 0, 1, 1], [], []>} : vector<8x8xf32>, vector<8x32xf32>, vector<8x32xf32> -> vector<8x32xf32>
    %6 = arith.addf %2, %5 : vector<8x32xf32>
    %c0_8 = arith.constant 0 : index
    %c0_9 = arith.constant 0 : index
    %7 = vector.load %arg7[%c0_8, %c0_9] : memref<1x32xf32, #tpu.memory_space<vmem>>, vector<1x32xf32>
    %8 = vector.broadcast %7 : vector<1x32xf32> to vector<8x32xf32>
    %9 = arith.addf %6, %8 : vector<8x32xf32>
    %c0_10 = arith.constant 0 : index
    %c0_11 = arith.constant 0 : index
    %10 = vector.load %arg4[%c0_10, %c0_11] : memref<32x32xf32, #tpu.memory_space<vmem>>, vector<32x32xf32>
    %c0_12 = arith.constant 0 : index
    %c0_13 = arith.constant 0 : index
    %11 = vector.load %arg0[%c0_12, %c0_13] : memref<8x32xf32, #tpu.memory_space<vmem>>, vector<8x32xf32>
    %cst_14 = arith.constant dense<0.000000e+00> : vector<8x32xf32>
    %12 = tpu.matmul %11, %10, %cst_14 {dimension_numbers = #tpu.dot_dimension_numbers<[1], [0], [0], [1], [0, 0, 1, 1], [], []>} : vector<8x32xf32>, vector<32x32xf32>, vector<8x32xf32> -> vector<8x32xf32>
    %13 = arith.addf %12, %9 : vector<8x32xf32>
    %c0_15 = arith.constant 0 : index
    %c0_16 = arith.constant 0 : index
    %14 = vector.load %arg8[%c0_15, %c0_16] : memref<8x32xf32, #tpu.memory_space<vmem>>, vector<8x32xf32>
    tpu.vector_store %arg8[%c0_15, %c0_16], %13 {strides = array<i32>} : memref<8x32xf32, #tpu.memory_space<vmem>>, vector<8x32xf32>,
    %c0_17 = arith.constant 0 : index
    %c0_18 = arith.constant 0 : index
    %15 = vector.load %arg1[%c0_17, %c0_18] : memref<8x32xf32, #tpu.memory_space<vmem>>, vector<8x32xf32>
    %cst_19 = arith.constant dense<0.000000e+00> : vector<8x32xf32>
    %16 = tpu.matmul %15, %10, %cst_19 {dimension_numbers = #tpu.dot_dimension_numbers<[1], [0], [0], [1], [0, 0, 1, 1], [], []>} : vector<8x32xf32>, vector<32x32xf32>, vector<8x32xf32> -> vector<8x32xf32>
    %17 = arith.addf %16, %9 : vector<8x32xf32>
    %c0_20 = arith.constant 0 : index
    %c0_21 = arith.constant 0 : index
    %18 = vector.load %arg9[%c0_20, %c0_21] : memref<8x32xf32, #tpu.memory_space<vmem>>, vector<8x32xf32>
    tpu.vector_store %arg9[%c0_20, %c0_21], %17 {strides = array<i32>} : memref<8x32xf32, #tpu.memory_space<vmem>>, vector<8x32xf32>,
    return
  }
}

</mosaic_0001>

<bundles_post_ra>
// kernel: tpu_custom_call.1
= control target key start
LH: loop header
LB: loop body
LE: loop exit
PB: predicated region body
PF: predicated region fallthrough
CT: control target
= control target key end

     0   :  { %15 = vsyncpa [#allocation3], 0  ;;  %s793_s0 = inlined_call_operand.hbm [shape: f32[8,32], index: 0, kind: input, shape index: {}]   ;;  %s794_s1 = inlined_call_operand.hbm [shape: f32[8,32], index: 1, kind: input, shape index: {}]   ;;  %s795_s2 = inlined_call_operand.hbm [shape: f32[8,16], index: 2, kind: input, shape index: {}]   ;;  %s796_s3 = inlined_call_operand.hbm [shape: f32[8,8], index: 3, kind: input, shape index: {}]   ;;  %s797_s4 = inlined_call_operand.hbm [shape: f32[32,32], index: 4, kind: input, shape index: {}]   ;;  %s798_s5 = inlined_call_operand.hbm [shape: f32[16,32], index: 5, kind: input, shape index: {}]   ;;  %s799_s6 = inlined_call_operand.vmem [shape: f32[8,32], index: 6, kind: input, shape index: {}]   ;;  %s800_s7 = inlined_call_operand.vmem [shape: f32[1,32], index: 7, kind: input, shape index: {}]   ;;  %s801_s8 = inlined_call_operand.hbm [shape: f32[8,32], index: 8, kind: output, shape index: {0}]   ;;  %s802_s9 = inlined_call_operand.hbm [shape: f32[8,32], index: 9, kind: output, shape index: {1}]  }
   0x1   :  { %16 = vsyncpa [#allocation6], 0 }
   0x2   :  { %17 = vsyncpa [#allocation9], 0 }
   0x3   :  { %18 = vsyncpa [#allocation12], 0 }
   0x4   :  { %19 = vsyncpa [#allocation4], 0 }
   0x5   :  { %20 = vsyncpa [#allocation15], 0  ;;  %s693_s30 = smov [#allocation5]   ;;  %s694_s11 = smov [#allocation8]  }
   0x6   :  { %s37_s10 = sshll.u32 %s693_s30, 4  ;;  %s57_s12 = sshll.u32 %s694_s11, 4  ;;  %s38_s10 = int_to_ptr.vmem [resolvable:$true] %s37_s10  ;;  %s58_s12 = int_to_ptr.vmem [resolvable:$true] %s57_s12 }
   0x7   :  { %s529_s13 = scalar_lea.vmem %s38_s10, 128  ;;  %p534_p1 = scmp.lt.s32.totalorder %s38_s10, %s38_s10 }
   0x8   :  { %p530_p0 = scmp.ne.s32.totalorder %s38_s10, %s529_s13  ;;  %p535_p2 = scmp.lt.s32.totalorder %s529_s13, %s529_s13 }
   0xa   :  { %p536_p3 = por %p535_p2, %p534_p1 }
   0xc   :  { %p537_p4 = pnand %p536_p3, %p530_p0 }
   0xe   :  { %540 = shalt.err (!%p537_p4)
}
   0xf   :  { %40 = dma.hbm_to_vmem [thread:$0]  %s794_s1, 128, %s38_s10, [#allocation6]  }
  0x10   :  { %s549_s16 = scalar_lea.vmem %s58_s12, 128  ;;  %p554_p6 = scmp.lt.s32.totalorder %s58_s12, %s58_s12 }
  0x11   :  { %p550_p5 = scmp.ne.s32.totalorder %s58_s12, %s549_s16  ;;  %p555_p7 = scmp.lt.s32.totalorder %s549_s16, %s549_s16 }
  0x13   :  { %p556_p8 = por %p555_p7, %p554_p6 }
  0x15   :  { %p557_p9 = pnand %p556_p8, %p550_p5 }
  0x17   :  { %560 = shalt.err (!%p557_p9)
}
  0x18   :  { %60 = dma.hbm_to_vmem [thread:$0]  %s796_s3, 128, %s58_s12, [#allocation9]  }
  0x19   :  { %s695_s19 = smov [#allocation2]   ;;  %s696_s21 = smov [#allocation7]  }
  0x1a   :  { %s27_s20 = sshll.u32 %s695_s19, 4  ;;  %s47_s22 = sshll.u32 %s696_s21, 4  ;;  %s28_s20 = int_to_ptr.vmem [resolvable:$true] %s27_s20  ;;  %s48_s22 = int_to_ptr.vmem [resolvable:$true] %s47_s22 }
  0x1b   :  { %s569_s23 = scalar_lea.vmem %s28_s20, 128  ;;  %p574_p11 = scmp.lt.s32.totalorder %s28_s20, %s28_s20 }
  0x1c   :  { %p570_p10 = scmp.ne.s32.totalorder %s28_s20, %s569_s23  ;;  %p575_p12 = scmp.lt.s32.totalorder %s569_s23, %s569_s23 }
  0x1e   :  { %p576_p13 = por %p575_p12, %p574_p11 }
  0x20   :  { %p577_p0 = pnand %p576_p13, %p570_p10 }
  0x22   :  { %580 = shalt.err (!%p577_p0)
}
  0x23   :  { %30 = dma.hbm_to_vmem [thread:$0]  %s793_s0, 128, %s28_s20, [#allocation3]  }
  0x24   :  { %s589_s25 = scalar_lea.vmem %s48_s22, 128  ;;  %p594_p2 = scmp.lt.s32.totalorder %s48_s22, %s48_s22 }
  0x25   :  { %p590_p1 = scmp.ne.s32.totalorder %s48_s22, %s589_s25  ;;  %p595_p3 = scmp.lt.s32.totalorder %s589_s25, %s589_s25 }
  0x27   :  { %p596_p4 = por %p595_p3, %p594_p2 }
  0x29   :  { %p597_p5 = pnand %p596_p4, %p590_p1 }
  0x2b   :  { %600 = shalt.err (!%p597_p5)
}
  0x2c   :  { %50 = dma.hbm_to_vmem [thread:$0]  %s795_s2, 128, %s48_s22, [#allocation6]  }
  0x2d   :  { %s697_s27 = smov [#allocation10]  }
  0x2e   :  { %s66_s28 = sshll.u32 %s697_s27, 4  ;;  %s67_s28 = int_to_ptr.vmem [resolvable:$true] %s66_s28 }
  0x2f   :  { %s609_s29 = scalar_lea.vmem %s67_s28, 512  ;;  %p614_p7 = scmp.lt.s32.totalorder %s67_s28, %s67_s28 }
  0x30   :  { %p610_p6 = scmp.ne.s32.totalorder %s67_s28, %s609_s29  ;;  %p615_p8 = scmp.lt.s32.totalorder %s609_s29, %s609_s29 }
  0x32   :  { %p616_p9 = por %p615_p8, %p614_p7 }
  0x34   :  { %p617_p10 = pnand %p616_p9, %p610_p6 }
  0x36   :  { %620 = shalt.err (!%p617_p10)
}
  0x37   :  { %s698_s0 = smov 128   ;;  %s699_s30 = smov 8  }
  0x38   :  { %72 = dma.hbm_to_vmem [thread:$0]  %s797_s4, 512, %s67_s28, [#allocation9], %s698_s0, %s698_s0, %s699_s30  }
  0x39   :  { %s700_s12 = smov [#allocation11]  }
  0x3a   :  { %s78_s13 = sshll.u32 %s700_s12, 4  ;;  %s79_s13 = int_to_ptr.vmem [resolvable:$true] %s78_s13 }
  0x3b   :  { %s629_s2 = scalar_lea.vmem %s79_s13, 256  ;;  %p634_p12 = scmp.lt.s32.totalorder %s79_s13, %s79_s13 }
  0x3c   :  { %p630_p11 = scmp.ne.s32.totalorder %s79_s13, %s629_s2  ;;  %p635_p13 = scmp.lt.s32.totalorder %s629_s2, %s629_s2 }
  0x3e   :  { %p636_p0 = por %p635_p13, %p634_p12 }
  0x40   :  { %p637_p1 = pnand %p636_p0, %p630_p11 }
  0x42   :  { %640 = shalt.err (!%p637_p1)
}
  0x43   :  { %84 = dma.hbm_to_vmem [thread:$0]  %s798_s5, 256, %s79_s13, [#allocation12], %s698_s0, %s698_s0, %s699_s30  }
  0x44   :  { %681 = dma.done.wait [#allocation3], 128  }
  0x45   :  { %682 = vsyncadd [#allocation3], 4294967168 }
  0x46   :  { %683 = dma.done.wait [#allocation6], 256  }
  0x47   :  { %684 = vsyncadd [#allocation6], 4294967040 }
  0x48   :  { %685 = dma.done.wait [#allocation9], 640  }
  0x49   :  { %686 = vsyncadd [#allocation9], 4294966656 }
  0x4a   :  { %687 = dma.done.wait [#allocation12], 256  }
  0x4b   :  { %688 = vsyncadd [#allocation12], 4294967040  ;;  %v701_v0 = vmov 0.0   ;;  %vm702_vm0 = vmmov 0   ;;  %v111_v1 = vld [vmem:[%s799_s6] sm:$0xff]  ;;  %v109_v2 = vld [vmem:[#allocation11 + $0x8] sm:$0xff] }
  0x4c   :  { %475 = vmatprep.subr.mxu0 %v701_v0  ;;  %480 = vmatprep.subr.mxu1 %v701_v0  ;;  %v110_v3 = vld [vmem:[#allocation8] sm:$0xff]  ;;  %vm112_vm1 = vcmask 64512   ;;  %v108_v4 = vld [vmem:[#allocation11] sm:$0xff]  ;;  %v107_v6 = vld [vmem:[#allocation7] sm:$0xff]  ;;  %vm186_vm2 = vcmask 130048   ;;  %vm273_vm3 = vcmask 261120  }
  0x4d   :  { %477 = vmatprep.mubr.msk.f32.mxu0 %vm702_vm0, %v701_v0  ;;  %484 = vmatprep.mubr.msk.f32.mxu1 %vm702_vm0, %v701_v0  ;;  %v271_v5 = vld [vmem:[#allocation10 + $0x18] sm:$0xff]  ;;  %v270_v7 = vld [vmem:[#allocation10 + $0x10] sm:$0xff]  ;;  %v269_v8 = vld [vmem:[#allocation10 + $0x8] sm:$0xff]  ;;  %s703_s17 = smov [#allocation13]   ;;  %s704_s19 = smov [#allocation14]  }
  0x4e   :  { %476 = vmatpush3.msra.mxu0 %v111_v1  ;;  %481 = vmatpush3.msra.mxu1 %v109_v2  ;;  %v268_v9 = vld [vmem:[#allocation10] sm:$0xff]  ;;  %v348_v11 = vld [vmem:[#allocation5] sm:$0xff]  ;;  %s429_s18 = sshll.u32 %s703_s17, 4  ;;  %s439_s20 = sshll.u32 %s704_s19, 4  ;;  %s430_s18 = int_to_ptr.vmem [resolvable:$true] %s429_s18  ;;  %s440_s20 = int_to_ptr.vmem [resolvable:$true] %s439_s20 }
  0x4f   :  { %482 = vmatprep.subr.mxu1 %v701_v0  ;;  %487 = vmatprep.subr.mxu0 %v701_v0  ;;  %v272_v10 = vld [vmem:[#allocation2] sm:$0xff]  ;;  %s641_s21 = scalar_lea.vmem %s430_s18, 128  ;;  %p646_p3 = scmp.lt.s32.totalorder %s430_s18, %s430_s18 }
  0x50   :  { %478 = vmatmul.mubr.msk.f32.vlgmr.msra.gmra.mxu0 %vm112_vm1, %v110_v3  ;;  %483 = vmatpush3.msra.mxu1 %v108_v4  ;;  %v457_v16 = vld [vmem:[%s800_s7] ss:$0 sm:$0xff]  ;;  %p642_p2 = scmp.ne.s32.totalorder %s430_s18, %s641_s21  ;;  %p647_p4 = scmp.lt.s32.totalorder %s641_s21, %s641_s21 }
  0x51   :  { %488 = vmatpush3.msra.mxu0 %v271_v5  ;;  %485 = vmatmul.mubr.msk.f32.vlgmr.msra.gmra.mxu1 %vm186_vm2, %v107_v6 }
  0x52   :  { %489 = vmatprep.subr.mxu0 %v701_v0  ;;  %498 = vmatprep.subr.mxu1 %v701_v0  ;;  %p648_p5 = por %p647_p4, %p646_p3 }
  0x53   :  { %490 = vmatpush3.msra.mxu0 %v270_v7  ;;  %499 = vmatpush3.msra.mxu1 %v271_v5 }
  0x54   :  { %491 = vmatprep.subr.mxu0 %v701_v0  ;;  %500 = vmatprep.subr.mxu1 %v701_v0  ;;  %p649_p6 = pnand %p648_p5, %p642_p2 }
  0x55   :  { %492 = vmatpush3.msra.mxu0 %v269_v8  ;;  %501 = vmatpush3.msra.mxu1 %v270_v7 }
  0x56   :  { %493 = vmatprep.subr.mxu0 %v701_v0  ;;  %502 = vmatprep.subr.mxu1 %v701_v0 }
  0x57   :  { %494 = vmatpush3.msra.mxu0 %v268_v9  ;;  %495 = vmatprep.mubr.msk.f32.mxu0 %vm702_vm0, %v701_v0 }
  0x58   :  { %503 = vmatpush3.msra.mxu1 %v269_v8  ;;  %496 = vmatmul.mubr.msk.f32.vlgmr.msra.gmra.mxu0 %vm273_vm3, %v272_v10 }
  0x59   :  { %504 = vmatprep.subr.mxu1 %v701_v0  ;;  %506 = vmatprep.mubr.msk.f32.mxu1 %vm702_vm0, %v701_v0 }
  0x5a   :  { %505 = vmatpush3.msra.mxu1 %v268_v9 }
  0x5b   :  { %507 = vmatmul.mubr.msk.f32.vlgmr.msra.gmra.mxu1 %vm273_vm3, %v348_v11 }
 0x110   :  { %v182_v12 = vpop.f32.mrf.mxu0 }
 0x111   :  { %v256_v13 = vpop.f32.mrf.mxu1 }
 0x112   :  { %v257_v14 = vadd.f32 %v256_v13, %v182_v12  ;;  %v479_v15 = vpop.f32.mrf.mxu0 }
 0x113   :  { %v486_v17 = vpop.f32.mrf.mxu1 }
 0x114   :  { %v267_v18 = vadd.f32 %v457_v16, %v257_v14 }
 0x118   :  { %v343_v19 = vpop.f32.mrf.mxu0 }
 0x119   :  { %v344_v20 = vadd.f32 %v343_v19, %v267_v18 }
 0x11a   :  { %v497_v21 = vpop.f32.mrf.mxu0 }
 0x11b   :  { %347 = vst.msk [vmem:[#allocation13] sm:$0xff] %vm273_vm3, %v344_v20  ;;  %v418_v22 = vpop.f32.mrf.mxu1 }
 0x11c   :  { %v419_v23 = vadd.f32 %v418_v22, %v267_v18 }
 0x11d   :  { %652 = shalt.err (!%p649_p6)
}
 0x11e   :  { %432 = dma.vmem_to_hbm [thread:$0]  %s430_s18, 128, %s801_s8, [#allocation4]   ;;  %v508_v24 = vpop.f32.mrf.mxu1  ;;  %422 = vst.msk [vmem:[#allocation14] sm:$0xff] %vm273_vm3, %v419_v23 }
 0x11f   :  { %s661_s23 = scalar_lea.vmem %s440_s20, 128  ;;  %p666_p8 = scmp.lt.s32.totalorder %s440_s20, %s440_s20 }
 0x120   :  { %p662_p7 = scmp.ne.s32.totalorder %s440_s20, %s661_s23  ;;  %p667_p9 = scmp.lt.s32.totalorder %s661_s23, %s661_s23 }
 0x122   :  { %p668_p10 = por %p667_p9, %p666_p8 }
 0x124   :  { %p669_p11 = pnand %p668_p10, %p662_p7 }
 0x126   :  { %672 = shalt.err (!%p669_p11)
}
 0x127   :  { %442 = dma.vmem_to_hbm [thread:$0]  %s440_s20, 128, %s802_s9, [#allocation15]  }
 0x128   :  { %689 = dma.done.wait [#allocation4], 128  }
 0x129   :  { %690 = vsyncadd [#allocation4], 4294967168 }
 0x12a   :  { %691 = dma.done.wait [#allocation15], 128  }
 0x12b   :  { %692 = vsyncadd [#allocation15], 4294967168 }
 0x12c   :  { %449 = vsyncpa [#allocation3], 1 }
 0x12d   :  { %450 = vsyncpa [#allocation6], 1 }
 0x12e   :  { %451 = vsyncpa [#allocation9], 1 }
 0x12f   :  { %452 = vsyncpa [#allocation12], 1 }
 0x130   :  { %453 = vsyncpa [#allocation4], 1 }
 0x131   :  { %454 = vsyncpa [#allocation15], 1 }

</bundles_post_ra>
